<compile_context>
chip_gen: v6e
topology: v6e:2x2x1
jax: 0.10.0
libtpu: 0.0.40
codegen_flags: <defaults>
</compile_context>

<pallas_src>
import math
from functools import partial

import jax
import jax.numpy as jnp
from jax import lax
from jax.experimental import pallas as pl
from jax.experimental.pallas import tpu as pltpu

GROUPS = 32
BASE_WIDTH = 8
EXPANSION = 4
LAYERS = (3, 4, 23, 3)          # resnext101
PLANES = (64, 128, 256, 512)
STRIDES = (1, 2, 2, 2)
NUM_CLASSES = 50
BN_EPS = 1e-5


# ----------------------------- small helpers --------------------------------

def _ru(x, m):
    return (x + m - 1) // m * m


def _pick_tile(padded, cands):
    for c in cands:
        if padded % c == 0:
            return c
    return cands[-1]


# --------------------------------------------------------------------------
# Fused matmul + BN(scale, shift) [+ residual] [+ ReLU] kernel.
# bf16 operands on the MXU, f32 accumulator scratch, epilogue applied in the
# final K step.  Used for every 1x1 conv, the im2col'd 7x7 stem and the fc.
# --------------------------------------------------------------------------

def _mm_fused_kernel(a_ref, b_ref, s_ref, h_ref, *rest, relu, has_res):
    if has_res:
        r_ref, o_ref, acc_ref = rest
    else:
        o_ref, acc_ref = rest

    @pl.when(pl.program_id(2) == 0)
    def _():
        acc_ref[...] = jnp.zeros_like(acc_ref)

    acc_ref[...] += jnp.dot(a_ref[...], b_ref[...],
                            preferred_element_type=jnp.float32)

    @pl.when(pl.program_id(2) == pl.num_programs(2) - 1)
    def _():
        y = acc_ref[...] * s_ref[...] + h_ref[...]
        if has_res:
            y = y + r_ref[...].astype(jnp.float32)
        if relu:
            y = jnp.maximum(y, 0.0)
        o_ref[...] = y.astype(o_ref.dtype)


@partial(jax.jit, static_argnames=("relu", "out_dtype"))
def matmul_fused(a, b, scale, shift, residual=None, relu=False,
                 out_dtype=jnp.bfloat16):
    """[relu]( (a @ b) * scale + shift [+ residual] );  a:[M,K], b:[K,N]."""
    M, K = a.shape
    _, N = b.shape
    Mp, Kp, Np = _ru(M, 8), _ru(K, 128), _ru(N, 128)
    tm = _pick_tile(Mp, (512, 256, 128, 64, 32, 16, 8))
    tn = _pick_tile(Np, (256, 128))
    tk = _pick_tile(Kp, (512, 256, 128))

    a_p = a.astype(jnp.bfloat16)
    if Mp != M or Kp != K:
        a_p = jnp.pad(a_p, ((0, Mp - M), (0, Kp - K)))
    b_p = b.astype(jnp.bfloat16)
    if Kp != K or Np != N:
        b_p = jnp.pad(b_p, ((0, Kp - K), (0, Np - N)))
    sc = scale.astype(jnp.float32).reshape(1, N)
    sh = shift.astype(jnp.float32).reshape(1, N)
    if Np != N:
        sc = jnp.pad(sc, ((0, 0), (0, Np - N)))
        sh = jnp.pad(sh, ((0, 0), (0, Np - N)))

    inputs = [a_p, b_p, sc, sh]
    in_specs = [
        pl.BlockSpec((tm, tk), lambda i, j, k: (i, k)),
        pl.BlockSpec((tk, tn), lambda i, j, k: (k, j)),
        pl.BlockSpec((1, tn), lambda i, j, k: (0, j)),
        pl.BlockSpec((1, tn), lambda i, j, k: (0, j)),
    ]
    has_res = residual is not None
    if has_res:
        r_p = residual.astype(jnp.bfloat16)
        if Mp != M or Np != N:
            r_p = jnp.pad(r_p, ((0, Mp - M), (0, Np - N)))
        inputs.append(r_p)
        in_specs.append(pl.BlockSpec((tm, tn), lambda i, j, k: (i, j)))

    out = pl.pallas_call(
        partial(_mm_fused_kernel, relu=relu, has_res=has_res),
        out_shape=jax.ShapeDtypeStruct((Mp, Np), out_dtype),
        grid_spec=pltpu.PrefetchScalarGridSpec(
            num_scalar_prefetch=0,
            grid=(Mp // tm, Np // tn, Kp // tk),
            in_specs=in_specs,
            out_specs=pl.BlockSpec((tm, tn), lambda i, j, k: (i, j)),
            scratch_shapes=[pltpu.VMEM((tm, tn), jnp.float32)]),
        compiler_params=pltpu.CompilerParams(
            dimension_semantics=("parallel", "parallel", "arbitrary")),
    )(*inputs)
    if Mp != M or Np != N:
        out = out[:M, :N]
    return out


# --------------------------------------------------------------------------
# Grouped 3x3 conv (groups=32) + BN + ReLU.
# Groups are packed 128/cgo per "supergroup": per-tap block-diagonal weights of
# shape [128, 128] make every matmul lane-dense (no 16x N-padding waste), and
# the 9 taps form the K-reduction grid axis, accumulating in f32 VMEM.
# --------------------------------------------------------------------------

def _gconv_kernel(a_ref, b_ref, s_ref, h_ref, o_ref, acc_ref):
    @pl.when(pl.program_id(2) == 0)
    def _():
        acc_ref[...] = jnp.zeros_like(acc_ref)

    acc_ref[...] += jnp.dot(a_ref[0], b_ref[0],
                            preferred_element_type=jnp.float32)

    @pl.when(pl.program_id(2) == pl.num_programs(2) - 1)
    def _():
        y = jnp.maximum(acc_ref[...] * s_ref[...] + h_ref[...], 0.0)
        o_ref[...] = y.astype(o_ref.dtype)


@partial(jax.jit, static_argnames=("stride",))
def grouped_conv3x3_bn_relu(x, w, scale, shift, stride=1):
    """x: [N,H,W,C] bf16; w (torch layout): [Cout, Cin/groups, 3, 3]."""
    N, H, W, C = x.shape
    cout, cg = w.shape[0], w.shape[1]
    cgo = cout // GROUPS
    gpb = 128 // cgo                # groups per 128-lane supergroup (gpb*cg == 128)
    S = GROUPS // gpb               # number of supergroups
    OH = (H + 2 - 3) // stride + 1
    OW = (W + 2 - 3) // stride + 1
    M = N * OH * OW

    # --- im2col tap stack: [9, M, C] (taps become the K grid axis) ----------
    # TODO(synk): the tap stack is still materialized in HBM by XLA glue;
    # in-kernel strided-window DMA is not implemented.
    xp = jnp.pad(x, ((0, 0), (1, 1), (1, 1), (0, 0)))
    taps = []
    for i in range(3):
        for j in range(3):
            taps.append(lax.slice(
                xp, (0, i, j, 0),
                (N, i + stride * (OH - 1) + 1, j + stride * (OW - 1) + 1, C),
                (1, stride, stride, 1)))
    a = jnp.stack(taps, axis=0).reshape(9, M, C).astype(jnp.bfloat16)
    Mp = _ru(M, 8)
    if Mp != M:
        a = jnp.pad(a, ((0, 0), (0, Mp - M), (0, 0)))
    tm = _pick_tile(Mp, (512, 256, 128, 64, 32, 16, 8))

    # --- per-tap block-diagonal weights: [S*9, 128, 128] ---------------------
    wr = w.reshape(S, gpb, cgo, cg, 3, 3)
    wr = jnp.transpose(wr, (0, 4, 5, 1, 3, 2)).reshape(S, 9, gpb, cg, cgo)
    eye = jnp.eye(gpb, dtype=wr.dtype)
    bd = jnp.einsum("stgio,gh->stgiho", wr, eye)
    bd = bd.reshape(S * 9, gpb * cg, gpb * cgo).astype(jnp.bfloat16)

    sc = scale.astype(jnp.float32).reshape(1, cout)
    sh = shift.astype(jnp.float32).reshape(1, cout)

    out = pl.pallas_call(
        _gconv_kernel,
        out_shape=jax.ShapeDtypeStruct((Mp, cout), jnp.bfloat16),
        grid_spec=pltpu.PrefetchScalarGridSpec(
            num_scalar_prefetch=0,
            grid=(S, Mp // tm, 9),
            in_specs=[
                pl.BlockSpec((1, tm, 128), lambda s, i, t: (t, i, s)),
                pl.BlockSpec((1, 128, 128), lambda s, i, t: (s * 9 + t, 0, 0)),
                pl.BlockSpec((1, 128), lambda s, i, t: (0, s)),
                pl.BlockSpec((1, 128), lambda s, i, t: (0, s)),
            ],
            out_specs=pl.BlockSpec((tm, 128), lambda s, i, t: (i, s)),
            scratch_shapes=[pltpu.VMEM((tm, 128), jnp.float32)]),
        compiler_params=pltpu.CompilerParams(
            dimension_semantics=("parallel", "parallel", "arbitrary")),
    )(a, bd, sc, sh)
    if Mp != M:
        out = out[:M]
    return out.reshape(N, OH, OW, cout)


# ----------------------------- pooling kernels --------------------------------

def _maxpool_kernel(x_ref, o_ref):
    o_ref[...] = jnp.max(x_ref[...], axis=0)


@jax.jit
def maxpool3x3s2p1(x):
    """MaxPool2d(kernel=3, stride=2, padding=1) on NHWC (tiled over rows)."""
    N, H, W, C = x.shape
    OH = (H + 2 - 3) // 2 + 1
    OW = (W + 2 - 3) // 2 + 1
    M = N * OH * OW
    xp = jnp.pad(x, ((0, 0), (1, 1), (1, 1), (0, 0)),
                 constant_values=-jnp.inf)
    wins = []
    for i in range(3):
        for j in range(3):
            wins.append(lax.slice(
                xp, (0, i, j, 0),
                (N, i + 2 * (OH - 1) + 1, j + 2 * (OW - 1) + 1, C),
                (1, 2, 2, 1)))
    stacked = jnp.stack(wins, axis=0).reshape(9, M, C)
    Mp = _ru(M, 8)
    if Mp != M:
        stacked = jnp.pad(stacked, ((0, 0), (0, Mp - M), (0, 0)))
    tm = _pick_tile(Mp, (1024, 512, 256, 128, 64, 32, 16, 8))
    y = pl.pallas_call(
        _maxpool_kernel,
        out_shape=jax.ShapeDtypeStruct((Mp, C), x.dtype),
        grid_spec=pltpu.PrefetchScalarGridSpec(
            num_scalar_prefetch=0,
            grid=(Mp // tm,),
            in_specs=[pl.BlockSpec((9, tm, C), lambda i: (0, i, 0))],
            out_specs=pl.BlockSpec((tm, C), lambda i: (i, 0))),
        compiler_params=pltpu.CompilerParams(
            dimension_semantics=("parallel",)),
    )(stacked)
    if Mp != M:
        y = y[:M]
    return y.reshape(N, OH, OW, C)


def _avgpool_kernel(x_ref, o_ref):
    o_ref[...] = jnp.mean(x_ref[...].astype(jnp.float32),
                          axis=1).astype(o_ref.dtype)


@jax.jit
def global_avgpool(x):
    """AdaptiveAvgPool2d(1) on NHWC -> [N, C] f32 (tiled over channels)."""
    N, H, W, C = x.shape
    xr = x.reshape(N, H * W, C)
    tc = 128 if C % 128 == 0 else C
    return pl.pallas_call(
        _avgpool_kernel,
        out_shape=jax.ShapeDtypeStruct((N, C), jnp.float32),
        grid_spec=pltpu.PrefetchScalarGridSpec(
            num_scalar_prefetch=0,
            grid=(C // tc,),
            in_specs=[pl.BlockSpec((N, H * W, tc), lambda c: (0, 0, c))],
            out_specs=pl.BlockSpec((N, tc), lambda c: (0, c))),
        compiler_params=pltpu.CompilerParams(
            dimension_semantics=("parallel",)),
    )(xr)


# ----------------------------- conv wrappers ----------------------------------

@partial(jax.jit, static_argnames=("stride", "relu"))
def conv1x1_bn(x, w, scale, shift, residual=None, stride=1, relu=True):
    """1x1 conv + BN [+ residual] [+ ReLU], fused into the matmul epilogue."""
    if stride > 1:
        x = x[:, ::stride, ::stride, :]
    N, H, W, C = x.shape
    cout = w.shape[0]
    a = x.reshape(N * H * W, C)
    wm = jnp.transpose(w.reshape(cout, C), (1, 0))
    r = residual.reshape(N * H * W, cout) if residual is not None else None
    y = matmul_fused(a, wm, scale, shift, residual=r, relu=relu)
    return y.reshape(N, H, W, cout)


@jax.jit
def stem_conv_bn_relu(x, w, scale, shift):
    """7x7 stride-2 pad-3 conv + BN + ReLU via im2col + fused matmul."""
    N, H, W, C = x.shape
    cout = w.shape[0]
    kh = kw = 7
    stride, pad = 2, 3
    OH = (H + 2 * pad - kh) // stride + 1
    OW = (W + 2 * pad - kw) // stride + 1
    xp = jnp.pad(x, ((0, 0), (pad, pad), (pad, pad), (0, 0)))
    cols = []
    for i in range(kh):
        for j in range(kw):
            cols.append(lax.slice(
                xp, (0, i, j, 0),
                (N, i + stride * (OH - 1) + 1, j + stride * (OW - 1) + 1, C),
                (1, stride, stride, 1)))
    patches = jnp.stack(cols, axis=3)                 # [N, OH, OW, 49, 3]
    a = patches.reshape(N * OH * OW, kh * kw * C)
    wm = jnp.transpose(w, (2, 3, 1, 0)).reshape(kh * kw * C, cout)
    y = matmul_fused(a, wm, scale, shift, relu=True)
    return y.reshape(N, OH, OW, cout)


# ----------------------------- parameters ------------------------------------

def _init_conv(key, cout, cin, kh, kw):
    std = math.sqrt(2.0 / (cin * kh * kw))
    return (std * jax.random.normal(key, (cout, cin, kh, kw))).astype(jnp.float32)


def _init_bn(key, c):
    k1, k2, k3, k4 = jax.random.split(key, 4)
    gamma = jax.random.uniform(k1, (c,), minval=0.8, maxval=1.2)
    beta = 0.05 * jax.random.normal(k2, (c,))
    mean = 0.05 * jax.random.normal(k3, (c,))
    var = jax.random.uniform(k4, (c,), minval=0.8, maxval=1.2)
    scale = gamma / jnp.sqrt(var + BN_EPS)
    shift = beta - mean * scale
    return scale.astype(jnp.float32), shift.astype(jnp.float32)


def init_params(key):
    params = {}
    key, k1, k2 = jax.random.split(key, 3)
    params["conv1"] = _init_conv(k1, 64, 3, 7, 7)
    params["bn1"] = _init_bn(k2, 64)
    inplanes = 64
    layers = []
    for planes, nblocks, stride0 in zip(PLANES, LAYERS, STRIDES):
        blocks = []
        for b in range(nblocks):
            s = stride0 if b == 0 else 1
            width = int(planes * (BASE_WIDTH / 64.0)) * GROUPS
            key, *ks = jax.random.split(key, 9)
            blk = {
                "conv1": _init_conv(ks[0], width, inplanes, 1, 1),
                "bn1": _init_bn(ks[1], width),
                "conv2": _init_conv(ks[2], width, width // GROUPS, 3, 3),
                "bn2": _init_bn(ks[3], width),
                "conv3": _init_conv(ks[4], planes * EXPANSION, width, 1, 1),
                "bn3": _init_bn(ks[5], planes * EXPANSION),
            }
            if s != 1 or inplanes != planes * EXPANSION:
                blk["ds_conv"] = _init_conv(ks[6], planes * EXPANSION, inplanes, 1, 1)
                blk["ds_bn"] = _init_bn(ks[7], planes * EXPANSION)
            blocks.append(blk)
            inplanes = planes * EXPANSION
        layers.append(blocks)
    params["layers"] = layers
    key, kw_, kb_ = jax.random.split(key, 3)
    feat = PLANES[-1] * EXPANSION            # 2048
    params["fc_w"] = (0.02 * jax.random.normal(kw_, (NUM_CLASSES, feat))).astype(jnp.float32)
    params["fc_b"] = (0.02 * jax.random.normal(kb_, (NUM_CLASSES,))).astype(jnp.float32)
    return params


# ----------------------------- forward pass ----------------------------------

def bottleneck(x, blk, stride):
    out = conv1x1_bn(x, blk["conv1"], blk["bn1"][0], blk["bn1"][1], relu=True)
    out = grouped_conv3x3_bn_relu(out, blk["conv2"], blk["bn2"][0],
                                  blk["bn2"][1], stride=stride)
    if "ds_conv" in blk:
        idt = conv1x1_bn(x, blk["ds_conv"], blk["ds_bn"][0], blk["ds_bn"][1],
                         stride=stride, relu=False)
    else:
        idt = x
    # conv3 + bn3 + skip-add + relu fused into one matmul epilogue
    return conv1x1_bn(out, blk["conv3"], blk["bn3"][0], blk["bn3"][1],
                      residual=idt, relu=True)


def resnet_forward(params, x_nchw):
    # matches: x = self.model(x)  with self.model.fc = nn.Linear(2048, 50)
    x = jnp.transpose(x_nchw.astype(jnp.float32), (0, 2, 3, 1))   # NCHW -> NHWC
    x = stem_conv_bn_relu(x, params["conv1"], params["bn1"][0], params["bn1"][1])
    x = maxpool3x3s2p1(x)
    for stage, blocks in enumerate(params["layers"]):
        for b_idx, blk in enumerate(blocks):
            s = STRIDES[stage] if b_idx == 0 else 1
            x = bottleneck(x, blk, s)
    feat = global_avgpool(x)                                      # [N, 2048] f32
    logits = matmul_fused(feat, jnp.transpose(params["fc_w"]),
                          jnp.ones((NUM_CLASSES,), jnp.float32),
                          params["fc_b"], relu=False,
                          out_dtype=jnp.float32)                  # bias fused
    return logits


# TODO(synk): pretrained ImageNet weight loading (ResNeXt101_32X8D_Weights) is
# replaced by deterministic random init; BatchNorm runs in inference mode.

if __name__ == "__main__":
    key = jax.random.PRNGKey(0)
    pkey, xkey = jax.random.split(key)
    params = init_params(pkey)
    # small input consistent with the module: NCHW, 3 channels, /32 downsample ok
    x = jax.random.normal(xkey, (2, 3, 32, 32), jnp.float32)
    logits = resnet_forward(params, x)
    logits = jax.block_until_ready(logits)
    assert logits.shape == (2, NUM_CLASSES), logits.shape
    assert bool(jnp.all(jnp.isfinite(logits)))
    print("KERNEL_OK")
</pallas_src>

<mosaic_0001>
module attributes {stable_mosaic.version = 11 : i64} {
  func.func @_mm_fused_kernel(%arg0: i32, %arg1: i32, %arg2: i32, %arg3: memref<512x256xbf16, #tpu.memory_space<vmem>>, %arg4: memref<256x128xbf16, #tpu.memory_space<vmem>>, %arg5: memref<1x128xf32, #tpu.memory_space<vmem>>, %arg6: memref<1x128xf32, #tpu.memory_space<vmem>>, %arg7: memref<512x128xbf16, #tpu.memory_space<vmem>>, %arg8: memref<512x128xf32, #tpu.memory_space<vmem>>) attributes {dimension_semantics = [#tpu.dimension_semantics<parallel>, #tpu.dimension_semantics<parallel>, #tpu.dimension_semantics<arbitrary>], iteration_bounds = array<i64: 1, 1, 1>, scalar_prefetch = 0 : i64, scratch_operands = 1 : i64, tpu.core_type = #tpu.core_type<tc>, window_params = [{transform_indices = @transform_0, window_bounds = array<i64: 512, 256>}, {transform_indices = @transform_1, window_bounds = array<i64: 256, 128>}, {transform_indices = @transform_2, window_bounds = array<i64: 1, 128>}, {transform_indices = @transform_3, window_bounds = array<i64: 1, 128>}, {transform_indices = @transform_4, window_bounds = array<i64: 512, 128>}]} {
    %c0_i32 = arith.constant 0 : i32
    %0 = arith.cmpi eq, %arg2, %c0_i32 : i32
    %1 = arith.extui %0 : i1 to i32
    %c0_i32_0 = arith.constant 0 : i32
    %2 = arith.cmpi ne, %1, %c0_i32_0 : i32
    scf.if %2 {
      %cst_10 = arith.constant 0.000000e+00 : f32
      %12 = vector.broadcast %cst_10 : f32 to vector<512x128xf32>
      %c0_11 = arith.constant 0 : index
      %c0_12 = arith.constant 0 : index
      %13 = vector.load %arg8[%c0_11, %c0_12] : memref<512x128xf32, #tpu.memory_space<vmem>>, vector<512x128xf32>
      tpu.vector_store %arg8[%c0_11, %c0_12], %12 {strides = array<i32>} : memref<512x128xf32, #tpu.memory_space<vmem>>, vector<512x128xf32>,
    } else {
    }
    %c0 = arith.constant 0 : index
    %c0_1 = arith.constant 0 : index
    %3 = vector.load %arg8[%c0, %c0_1] : memref<512x128xf32, #tpu.memory_space<vmem>>, vector<512x128xf32>
    %c0_2 = arith.constant 0 : index
    %c0_3 = arith.constant 0 : index
    %4 = vector.load %arg3[%c0_2, %c0_3] : memref<512x256xbf16, #tpu.memory_space<vmem>>, vector<512x256xbf16>
    %c0_4 = arith.constant 0 : index
    %c0_5 = arith.constant 0 : index
    %5 = vector.load %arg4[%c0_4, %c0_5] : memref<256x128xbf16, #tpu.memory_space<vmem>>, vector<256x128xbf16>
    %cst = arith.constant dense<0.000000e+00> : vector<512x128xf32>
    %6 = tpu.matmul %4, %5, %cst {dimension_numbers = #tpu.dot_dimension_numbers<[1], [0], [0], [1], [0, 0, 1, 1], [], []>} : vector<512x256xbf16>, vector<256x128xbf16>, vector<512x128xf32> -> vector<512x128xf32>
    %7 = arith.addf %3, %6 : vector<512x128xf32>
    %c0_6 = arith.constant 0 : index
    %c0_7 = arith.constant 0 : index
    %8 = vector.load %arg8[%c0_6, %c0_7] : memref<512x128xf32, #tpu.memory_space<vmem>>, vector<512x128xf32>
    tpu.vector_store %arg8[%c0_6, %c0_7], %7 {strides = array<i32>} : memref<512x128xf32, #tpu.memory_space<vmem>>, vector<512x128xf32>,
    %c0_i32_8 = arith.constant 0 : i32
    %9 = arith.cmpi eq, %arg2, %c0_i32_8 : i32
    %10 = arith.extui %9 : i1 to i32
    %c0_i32_9 = arith.constant 0 : i32
    %11 = arith.cmpi ne, %10, %c0_i32_9 : i32
    scf.if %11 {
      %c0_10 = arith.constant 0 : index
      %c0_11 = arith.constant 0 : index
      %12 = vector.load %arg8[%c0_10, %c0_11] : memref<512x128xf32, #tpu.memory_space<vmem>>, vector<512x128xf32>
      %c0_12 = arith.constant 0 : index
      %c0_13 = arith.constant 0 : index
      %13 = vector.load %arg5[%c0_12, %c0_13] : memref<1x128xf32, #tpu.memory_space<vmem>>, vector<1x128xf32>
      %14 = vector.broadcast %13 : vector<1x128xf32> to vector<512x128xf32>
      %15 = arith.mulf %12, %14 : vector<512x128xf32>
      %c0_14 = arith.constant 0 : index
      %c0_15 = arith.constant 0 : index
      %16 = vector.load %arg6[%c0_14, %c0_15] : memref<1x128xf32, #tpu.memory_space<vmem>>, vector<1x128xf32>
      %17 = vector.broadcast %16 : vector<1x128xf32> to vector<512x128xf32>
      %18 = arith.addf %15, %17 : vector<512x128xf32>
      %cst_16 = arith.constant 0.000000e+00 : f32
      %19 = vector.broadcast %cst_16 : f32 to vector<512x128xf32>
      %20 = arith.maximumf %18, %19 : vector<512x128xf32>
      %21 = arith.truncf %20 : vector<512x128xf32> to vector<512x128xbf16>
      %c0_17 = arith.constant 0 : index
      %c0_18 = arith.constant 0 : index
      %22 = vector.load %arg7[%c0_17, %c0_18] : memref<512x128xbf16, #tpu.memory_space<vmem>>, vector<512x128xbf16>
      tpu.vector_store %arg7[%c0_17, %c0_18], %21 {strides = array<i32>} : memref<512x128xbf16, #tpu.memory_space<vmem>>, vector<512x128xbf16>,
    } else {
    }
    return
  }
  func.func @transform_0(%arg0: i32, %arg1: i32, %arg2: i32) -> (i32, i32) {
    %c0_i32 = arith.constant 0 : i32
    return %arg0, %arg2 : i32, i32
  }
  func.func @transform_1(%arg0: i32, %arg1: i32, %arg2: i32) -> (i32, i32) {
    %c0_i32 = arith.constant 0 : i32
    return %arg2, %arg1 : i32, i32
  }
  func.func @transform_2(%arg0: i32, %arg1: i32, %arg2: i32) -> (i32, i32) {
    %c0_i32 = arith.constant 0 : i32
    %c0_i32_0 = arith.constant 0 : i32
    return %c0_i32, %arg1 : i32, i32
  }
  func.func @transform_3(%arg0: i32, %arg1: i32, %arg2: i32) -> (i32, i32) {
    %c0_i32 = arith.constant 0 : i32
    %c0_i32_0 = arith.constant 0 : i32
    return %c0_i32, %arg1 : i32, i32
  }
  func.func @transform_4(%arg0: i32, %arg1: i32, %arg2: i32) -> (i32, i32) {
    %c0_i32 = arith.constant 0 : i32
    return %arg0, %arg1 : i32, i32
  }
}

</mosaic_0001>

<bundles_post_ra>
// kernel: matmul_fused.1
= control target key start
LH: loop header
LB: loop body
LE: loop exit
PB: predicated region body
PF: predicated region fallthrough
CT: control target
= control target key end

     0   :  { %v2222_v0 = vmov 0   ;;  %s2754_s1 = inlined_call_operand.vmem [shape: bf16[256,128], index: 1, kind: input, shape index: {}]   ;;  %s2755_s0 = inlined_call_operand.vmem [shape: bf16[512,256], index: 0, kind: input, shape index: {}]   ;;  %s2756_s2 = inlined_call_operand.vmem [shape: f32[1,128], index: 2, kind: input, shape index: {}]   ;;  %s2757_s3 = inlined_call_operand.vmem [shape: f32[1,128], index: 3, kind: input, shape index: {}]   ;;  %s2758_s4 = inlined_call_operand.vmem [shape: bf16[512,128], index: 4, kind: output, shape index: {}]  }
   0x1   :  { %662 = vmatprep.subr.bf16.mxu0 %v2222_v0  ;;  %2077 = vmatprep.subr.bf16.mxu1 %v2222_v0  ;;  %v2110_v1 = vld [vmem:[%s2754_s1 + $0x38] sm:$0xff]   ;;  %v2111_v2 = vld [vmem:[%s2754_s1 + $0x30] sm:$0xff]   ;;  %v2112_v3 = vld [vmem:[%s2754_s1 + $0x28] sm:$0xff]  }
   0x2   :  { %663 = vmatpush1.bf16.msra.mxu0 %v2110_v1  ;;  %2093 = vmatpush1.bf16.msra.mxu1 %v2110_v1  ;;  %v2113_v4 = vld [vmem:[%s2754_s1 + $0x20] sm:$0xff]   ;;  %v2114_v5 = vld [vmem:[%s2754_s1 + $0x18] sm:$0xff]   ;;  %v2115_v7 = vld [vmem:[%s2754_s1 + $0x10] sm:$0xff]  }
   0x3   :  { %664 = vmatprep.subr.bf16.mxu0 %v2222_v0  ;;  %2078 = vmatprep.subr.bf16.mxu1 %v2222_v0  ;;  %v2128_v6 = vld [vmem:[%s2755_s0 + $0x4] ss:$8 sps:$4 sm:$0xff]   ;;  %v2118_v11 = vld [vmem:[%s2754_s1 + $0x78] sm:$0xff]   ;;  %v2119_v12 = vld [vmem:[%s2754_s1 + $0x70] sm:$0xff]  }
   0x4   :  { %v2131_v8 = vld [vmem:[%s2755_s0 + $0x104] ss:$8 sps:$4 sm:$0xff]   ;;  %694 = vmatprep.mubr.bf16.mxu0 %v2128_v6  ;;  %v2122_v15 = vld [vmem:[%s2754_s1 + $0x58] sm:$0xff]   ;;  %v2123_v16 = vld [vmem:[%s2754_s1 + $0x50] sm:$0xff]  }
   0x5   :  { %822 = vmatprep.mubr.bf16.mxu1 %v2131_v8  ;;  %v2116_v9 = vld [vmem:[%s2754_s1 + $0x8] sm:$0xff]   ;;  %v2117_v10 = vld [vmem:[%s2754_s1] sm:$0xff]   ;;  %v2132_v21 = vld [vmem:[%s2755_s0 + $0x14] ss:$8 sps:$4 sm:$0xff]  }
   0x6   :  { %665 = vmatpush1.bf16.msra.mxu0 %v2111_v2  ;;  %2094 = vmatpush1.bf16.msra.mxu1 %v2111_v2  ;;  %v2120_v13 = vld [vmem:[%s2754_s1 + $0x68] sm:$0xff]   ;;  %v2121_v14 = vld [vmem:[%s2754_s1 + $0x60] sm:$0xff]   ;;  %v2134_v22 = vld [vmem:[%s2755_s0 + $0x114] ss:$8 sps:$4 sm:$0xff]  }
   0x7   :  { %666 = vmatprep.subr.bf16.mxu0 %v2222_v0  ;;  %2079 = vmatprep.subr.bf16.mxu1 %v2222_v0  ;;  %v2124_v17 = vld [vmem:[%s2754_s1 + $0x48] sm:$0xff]   ;;  %v2125_v18 = vld [vmem:[%s2754_s1 + $0x40] sm:$0xff]   ;;  %v2136_v23 = vld [vmem:[%s2755_s0 + $0x10] ss:$8 sps:$4 sm:$0xff]  }
   0x8   :  { %v2126_v19 = vld [vmem:[%s2755_s0] ss:$8 sps:$4 sm:$0xff]   ;;  %v2137_v24 = vld [vmem:[%s2755_s0 + $0x110] ss:$8 sps:$4 sm:$0xff]   ;;  %v2138_v25 = vld [vmem:[%s2755_s0 + $0x24] ss:$8 sps:$4 sm:$0xff]  }
   0x9   :  { %v2129_v20 = vld [vmem:[%s2755_s0 + $0x100] ss:$8 sps:$4 sm:$0xff]   ;;  %v2140_v26 = vld [vmem:[%s2755_s0 + $0x124] ss:$8 sps:$4 sm:$0xff]   ;;  %v2144_v29 = vld [vmem:[%s2755_s0 + $0x34] ss:$8 sps:$4 sm:$0xff]  }
   0xa   :  { %667 = vmatpush1.bf16.msra.mxu0 %v2112_v3  ;;  %2095 = vmatpush1.bf16.msra.mxu1 %v2112_v3  ;;  %v2142_v27 = vld [vmem:[%s2755_s0 + $0x20] ss:$8 sps:$4 sm:$0xff]   ;;  %v2146_v30 = vld [vmem:[%s2755_s0 + $0x134] ss:$8 sps:$4 sm:$0xff]   ;;  %v2148_v31 = vld [vmem:[%s2755_s0 + $0x30] ss:$8 sps:$4 sm:$0xff]  }
   0xb   :  { %668 = vmatprep.subr.bf16.mxu0 %v2222_v0  ;;  %2080 = vmatprep.subr.bf16.mxu1 %v2222_v0  ;;  %v2143_v28 = vld [vmem:[%s2755_s0 + $0x120] ss:$8 sps:$4 sm:$0xff]   ;;  %v2149_v32 = vld [vmem:[%s2755_s0 + $0x130] ss:$8 sps:$4 sm:$0xff]   ;;  %v2150_v33 = vld [vmem:[%s2755_s0 + $0x44] ss:$8 sps:$4 sm:$0xff]  }
   0xc   :  { %v2152_v34 = vld [vmem:[%s2755_s0 + $0x144] ss:$8 sps:$4 sm:$0xff]   ;;  %v2154_v35 = vld [vmem:[%s2755_s0 + $0x40] ss:$8 sps:$4 sm:$0xff]   ;;  %v2156_v37 = vld [vmem:[%s2755_s0 + $0x54] ss:$8 sps:$4 sm:$0xff]  }
   0xd   :  { %v2155_v36 = vld [vmem:[%s2755_s0 + $0x140] ss:$8 sps:$4 sm:$0xff]   ;;  %v2158_v38 = vld [vmem:[%s2755_s0 + $0x154] ss:$8 sps:$4 sm:$0xff]   ;;  %v2160_v39 = vld [vmem:[%s2755_s0 + $0x50] ss:$8 sps:$4 sm:$0xff]  }
   0xe   :  { %669 = vmatpush1.bf16.msra.mxu0 %v2113_v4  ;;  %2096 = vmatpush1.bf16.msra.mxu1 %v2113_v4  ;;  %v2161_v40 = vld [vmem:[%s2755_s0 + $0x150] ss:$8 sps:$4 sm:$0xff]   ;;  %v2162_v41 = vld [vmem:[%s2755_s0 + $0x64] ss:$8 sps:$4 sm:$0xff]   ;;  %v2166_v43 = vld [vmem:[%s2755_s0 + $0x60] ss:$8 sps:$4 sm:$0xff]  }
   0xf   :  { %670 = vmatprep.subr.bf16.mxu0 %v2222_v0  ;;  %2081 = vmatprep.subr.bf16.mxu1 %v2222_v0  ;;  %v2164_v42 = vld [vmem:[%s2755_s0 + $0x164] ss:$8 sps:$4 sm:$0xff]   ;;  %v2167_v44 = vld [vmem:[%s2755_s0 + $0x160] ss:$8 sps:$4 sm:$0xff]   ;;  %v2168_v45 = vld [vmem:[%s2755_s0 + $0x74] ss:$8 sps:$4 sm:$0xff]  }
  0x10   :  { %v2170_v46 = vld [vmem:[%s2755_s0 + $0x174] ss:$8 sps:$4 sm:$0xff]   ;;  %v2172_v47 = vld [vmem:[%s2755_s0 + $0x70] ss:$8 sps:$4 sm:$0xff]   ;;  %v2174_v49 = vld [vmem:[%s2755_s0 + $0x84] ss:$8 sps:$4 sm:$0xff]  }
  0x11   :  { %v2173_v48 = vld [vmem:[%s2755_s0 + $0x170] ss:$8 sps:$4 sm:$0xff]   ;;  %v2176_v50 = vld [vmem:[%s2755_s0 + $0x184] ss:$8 sps:$4 sm:$0xff]   ;;  %v2178_v51 = vld [vmem:[%s2755_s0 + $0x80] ss:$8 sps:$4 sm:$0xff]  }
  0x12   :  { %671 = vmatpush1.bf16.msra.mxu0 %v2114_v5  ;;  %2097 = vmatpush1.bf16.msra.mxu1 %v2114_v5  ;;  %v2179_v52 = vld [vmem:[%s2755_s0 + $0x180] ss:$8 sps:$4 sm:$0xff]   ;;  %v2180_v53 = vld [vmem:[%s2755_s0 + $0x94] ss:$8 sps:$4 sm:$0xff]   ;;  %v2184_v55 = vld [vmem:[%s2755_s0 + $0x90] ss:$8 sps:$4 sm:$0xff]  }
  0x13   :  { %672 = vmatprep.subr.bf16.mxu0 %v2222_v0  ;;  %2082 = vmatprep.subr.bf16.mxu1 %v2222_v0  ;;  %v2182_v54 = vld [vmem:[%s2755_s0 + $0x194] ss:$8 sps:$4 sm:$0xff]   ;;  %v2185_v56 = vld [vmem:[%s2755_s0 + $0x190] ss:$8 sps:$4 sm:$0xff]   ;;  %v2186_v57 = vld [vmem:[%s2755_s0 + $0xa4] ss:$8 sps:$4 sm:$0xff]  }
  0x14   :  { %v2188_v58 = vld [vmem:[%s2755_s0 + $0x1a4] ss:$8 sps:$4 sm:$0xff]   ;;  %v2190_v59 = vld [vmem:[%s2755_s0 + $0xa0] ss:$8 sps:$4 sm:$0xff]   ;;  %v2192_v61 = vld [vmem:[%s2755_s0 + $0xb4] ss:$8 sps:$4 sm:$0xff]  }
  0x15   :  { %v2191_v60 = vld [vmem:[%s2755_s0 + $0x1a0] ss:$8 sps:$4 sm:$0xff]   ;;  %v2194_v62 = vld [vmem:[%s2755_s0 + $0x1b4] ss:$8 sps:$4 sm:$0xff]   ;;  %v2196_v63 = vld [vmem:[%s2755_s0 + $0xb0] ss:$8 sps:$4 sm:$0xff]  }
  0x16   :  { %673 = vmatpush1.bf16.msra.mxu0 %v2115_v7  ;;  %2098 = vmatpush1.bf16.msra.mxu1 %v2115_v7  ;;  %v2198_v1 = vld [vmem:[%s2755_s0 + $0xc4] ss:$8 sps:$4 sm:$0xff]   ;;  %v2202_v3 = vld [vmem:[%s2755_s0 + $0xc0] ss:$8 sps:$4 sm:$0xff]   ;;  %v2204_v5 = vld [vmem:[%s2755_s0 + $0xd4] ss:$8 sps:$4 sm:$0xff]  }
  0x17   :  { %674 = vmatprep.subr.bf16.mxu0 %v2222_v0  ;;  %2083 = vmatprep.subr.bf16.mxu1 %v2222_v0  ;;  %v2200_v2 = vld [vmem:[%s2755_s0 + $0x1c4] ss:$8 sps:$4 sm:$0xff]   ;;  %v2203_v4 = vld [vmem:[%s2755_s0 + $0x1c0] ss:$8 sps:$4 sm:$0xff]   ;;  %v2206_v6 = vld [vmem:[%s2755_s0 + $0x1d4] ss:$8 sps:$4 sm:$0xff]  }
  0x18   :  { %v2208_v7 = vld [vmem:[%s2755_s0 + $0xd0] ss:$8 sps:$4 sm:$0xff]  }
  0x19   :  { %v2209_v8 = vld [vmem:[%s2755_s0 + $0x1d0] ss:$8 sps:$4 sm:$0xff]  }
  0x1a   :  { %675 = vmatpush1.bf16.msra.mxu0 %v2116_v9  ;;  %2099 = vmatpush1.bf16.msra.mxu1 %v2116_v9  ;;  %v2210_v9 = vld [vmem:[%s2755_s0 + $0xe4] ss:$8 sps:$4 sm:$0xff]  }
  0x1b   :  { %676 = vmatprep.subr.bf16.mxu0 %v2222_v0  ;;  %2084 = vmatprep.subr.bf16.mxu1 %v2222_v0 }
  0x1e   :  { %677 = vmatpush1.bf16.msra.mxu0 %v2117_v10  ;;  %2100 = vmatpush1.bf16.msra.mxu1 %v2117_v10  ;;  %v2212_v10 = vld [vmem:[%s2755_s0 + $0x1e4] ss:$8 sps:$4 sm:$0xff]  }
  0x1f   :  { %678 = vmatprep.subr.bf16.mxu0 %v2222_v0  ;;  %2085 = vmatprep.subr.bf16.mxu1 %v2222_v0 }
  0x22   :  { %679 = vmatpush2.bf16.msra.mxu0 %v2118_v11  ;;  %2101 = vmatpush2.bf16.msra.mxu1 %v2118_v11  ;;  %v2214_v11 = vld [vmem:[%s2755_s0 + $0xe0] ss:$8 sps:$4 sm:$0xff]  }
  0x23   :  { %680 = vmatprep.subr.bf16.mxu0 %v2222_v0  ;;  %2086 = vmatprep.subr.bf16.mxu1 %v2222_v0 }
  0x26   :  { %681 = vmatpush2.bf16.msra.mxu0 %v2119_v12  ;;  %2102 = vmatpush2.bf16.msra.mxu1 %v2119_v12  ;;  %v2215_v12 = vld [vmem:[%s2755_s0 + $0x1e0] ss:$8 sps:$4 sm:$0xff]  }
  0x27   :  { %682 = vmatprep.subr.bf16.mxu0 %v2222_v0  ;;  %2087 = vmatprep.subr.bf16.mxu1 %v2222_v0 }
  0x2a   :  { %683 = vmatpush2.bf16.msra.mxu0 %v2120_v13  ;;  %2103 = vmatpush2.bf16.msra.mxu1 %v2120_v13  ;;  %v2216_v13 = vld [vmem:[%s2755_s0 + $0xf4] ss:$8 sps:$4 sm:$0xff]  }
  0x2b   :  { %684 = vmatprep.subr.bf16.mxu0 %v2222_v0  ;;  %2088 = vmatprep.subr.bf16.mxu1 %v2222_v0 }
  0x2e   :  { %685 = vmatpush2.bf16.msra.mxu0 %v2121_v14  ;;  %2104 = vmatpush2.bf16.msra.mxu1 %v2121_v14  ;;  %v2218_v14 = vld [vmem:[%s2755_s0 + $0x1f4] ss:$8 sps:$4 sm:$0xff]  }
  0x2f   :  { %686 = vmatprep.subr.bf16.mxu0 %v2222_v0  ;;  %2089 = vmatprep.subr.bf16.mxu1 %v2222_v0 }
  0x32   :  { %687 = vmatpush2.bf16.msra.mxu0 %v2122_v15  ;;  %2105 = vmatpush2.bf16.msra.mxu1 %v2122_v15  ;;  %v2220_v15 = vld [vmem:[%s2755_s0 + $0xf0] ss:$8 sps:$4 sm:$0xff]  }
  0x33   :  { %688 = vmatprep.subr.bf16.mxu0 %v2222_v0  ;;  %2090 = vmatprep.subr.bf16.mxu1 %v2222_v0 }
  0x36   :  { %689 = vmatpush2.bf16.msra.mxu0 %v2123_v16  ;;  %2106 = vmatpush2.bf16.msra.mxu1 %v2123_v16  ;;  %v2221_v16 = vld [vmem:[%s2755_s0 + $0x1f0] ss:$8 sps:$4 sm:$0xff]  }
  0x37   :  { %690 = vmatprep.subr.bf16.mxu0 %v2222_v0  ;;  %2091 = vmatprep.subr.bf16.mxu1 %v2222_v0 }
  0x3a   :  { %691 = vmatpush2.bf16.msra.mxu0 %v2124_v17  ;;  %2107 = vmatpush2.bf16.msra.mxu1 %v2124_v17  ;;  %v2523_v17 = vld [vmem:[%s2756_s2] ss:$0 sm:$0xff] }
  0x3b   :  { %692 = vmatprep.subr.bf16.mxu0 %v2222_v0  ;;  %2092 = vmatprep.subr.bf16.mxu1 %v2222_v0  ;;  %v2197_v0 = vld [vmem:[%s2755_s0 + $0x1b0] ss:$8 sps:$4 sm:$0xff]  }
  0x3e   :  { %693 = vmatpush2.bf16.msra.mxu0 %v2125_v18  ;;  %2108 = vmatpush2.bf16.msra.mxu1 %v2125_v18 }
  0x41   :  { %695 = vmatmul.mubr.bf16.vlgmr.msra.gmra.mxu0 %v2126_v19  ;;  %823 = vmatmul.mubr.bf16.vlgmr.msra.gmra.mxu1 %v2129_v20 }
  0x42   :  { %702 = vmatprep.mubr.bf16.mxu0 %v2132_v21  ;;  %830 = vmatprep.mubr.bf16.mxu1 %v2134_v22  ;;  %v2529_v21 = vld [vmem:[%s2757_s3] ss:$0 sm:$0xff] }
  0x49   :  { %703 = vmatmul.mubr.bf16.gmra.mxu0 %v2136_v23  ;;  %831 = vmatmul.mubr.bf16.gmra.mxu1 %v2137_v24 }
  0x4a   :  { %710 = vmatprep.mubr.bf16.mxu0 %v2138_v25  ;;  %838 = vmatprep.mubr.bf16.mxu1 %v2140_v26 }
  0x51   :  { %711 = vmatmul.mubr.bf16.gmra.mxu0 %v2142_v27  ;;  %839 = vmatmul.mubr.bf16.gmra.mxu1 %v2143_v28 }
  0x52   :  { %718 = vmatprep.mubr.bf16.mxu0 %v2144_v29  ;;  %846 = vmatprep.mubr.bf16.mxu1 %v2146_v30 }
  0x59   :  { %719 = vmatmul.mubr.bf16.gmra.mxu0 %v2148_v31  ;;  %847 = vmatmul.mubr.bf16.gmra.mxu1 %v2149_v32 }
  0x5a   :  { %726 = vmatprep.mubr.bf16.mxu0 %v2150_v33  ;;  %854 = vmatprep.mubr.bf16.mxu1 %v2152_v34 }
  0x61   :  { %727 = vmatmul.mubr.bf16.gmra.mxu0 %v2154_v35  ;;  %855 = vmatmul.mubr.bf16.gmra.mxu1 %v2155_v36 }
  0x62   :  { %734 = vmatprep.mubr.bf16.mxu0 %v2156_v37  ;;  %862 = vmatprep.mubr.bf16.mxu1 %v2158_v38 }
  0x69   :  { %735 = vmatmul.mubr.bf16.gmra.mxu0 %v2160_v39  ;;  %863 = vmatmul.mubr.bf16.gmra.mxu1 %v2161_v40 }
  0x6a   :  { %742 = vmatprep.mubr.bf16.mxu0 %v2162_v41  ;;  %870 = vmatprep.mubr.bf16.mxu1 %v2164_v42 }
  0x71   :  { %743 = vmatmul.mubr.bf16.gmra.mxu0 %v2166_v43  ;;  %871 = vmatmul.mubr.bf16.gmra.mxu1 %v2167_v44 }
  0x72   :  { %750 = vmatprep.mubr.bf16.mxu0 %v2168_v45  ;;  %878 = vmatprep.mubr.bf16.mxu1 %v2170_v46 }
  0x79   :  { %751 = vmatmul.mubr.bf16.gmra.mxu0 %v2172_v47  ;;  %879 = vmatmul.mubr.bf16.gmra.mxu1 %v2173_v48 }
  0x7a   :  { %758 = vmatprep.mubr.bf16.mxu0 %v2174_v49  ;;  %886 = vmatprep.mubr.bf16.mxu1 %v2176_v50 }
  0x81   :  { %759 = vmatmul.mubr.bf16.gmra.mxu0 %v2178_v51  ;;  %887 = vmatmul.mubr.bf16.gmra.mxu1 %v2179_v52 }
  0x82   :  { %766 = vmatprep.mubr.bf16.mxu0 %v2180_v53  ;;  %894 = vmatprep.mubr.bf16.mxu1 %v2182_v54 }
  0x89   :  { %767 = vmatmul.mubr.bf16.gmra.mxu0 %v2184_v55  ;;  %895 = vmatmul.mubr.bf16.gmra.mxu1 %v2185_v56 }
  0x8a   :  { %774 = vmatprep.mubr.bf16.mxu0 %v2186_v57  ;;  %902 = vmatprep.mubr.bf16.mxu1 %v2188_v58 }
  0x91   :  { %775 = vmatmul.mubr.bf16.gmra.mxu0 %v2190_v59  ;;  %903 = vmatmul.mubr.bf16.gmra.mxu1 %v2191_v60 }
  0x92   :  { %782 = vmatprep.mubr.bf16.mxu0 %v2192_v61  ;;  %910 = vmatprep.mubr.bf16.mxu1 %v2194_v62 }
  0x99   :  { %783 = vmatmul.mubr.bf16.gmra.mxu0 %v2196_v63  ;;  %911 = vmatmul.mubr.bf16.gmra.mxu1 %v2197_v0 }
  0x9a   :  { %790 = vmatprep.mubr.bf16.mxu0 %v2198_v1  ;;  %918 = vmatprep.mubr.bf16.mxu1 %v2200_v2 }
  0xa1   :  { %791 = vmatmul.mubr.bf16.gmra.mxu0 %v2202_v3  ;;  %919 = vmatmul.mubr.bf16.gmra.mxu1 %v2203_v4 }
  0xa2   :  { %798 = vmatprep.mubr.bf16.mxu0 %v2204_v5  ;;  %926 = vmatprep.mubr.bf16.mxu1 %v2206_v6 }
  0xa9   :  { %799 = vmatmul.mubr.bf16.gmra.mxu0 %v2208_v7  ;;  %927 = vmatmul.mubr.bf16.gmra.mxu1 %v2209_v8 }
  0xaa   :  { %806 = vmatprep.mubr.bf16.mxu0 %v2210_v9  ;;  %934 = vmatprep.mubr.bf16.mxu1 %v2212_v10 }
  0xb1   :  { %807 = vmatmul.mubr.bf16.gmra.mxu0 %v2214_v11  ;;  %935 = vmatmul.mubr.bf16.gmra.mxu1 %v2215_v12 }
  0xb2   :  { %814 = vmatprep.mubr.bf16.mxu0 %v2216_v13  ;;  %942 = vmatprep.mubr.bf16.mxu1 %v2218_v14 }
  0xb9   :  { %815 = vmatmul.mubr.bf16.gmra.mxu0 %v2220_v15  ;;  %943 = vmatmul.mubr.bf16.gmra.mxu1 %v2221_v16 }
 0x101   :  { %v696_v18 = vpop.f32.mrf.mxu0  ;;  %v824_v19 = vpop.f32.mrf.mxu1 }
 0x102   :  { %v1153_v20 = vmul.f32 %v2523_v17, %v696_v18  ;;  %v1185_v22 = vmul.f32 %v2523_v17, %v824_v19 }
 0x103   :  { %v698_v23 = vpop.f32.mrf.mxu0  ;;  %v826_v24 = vpop.f32.mrf.mxu1 }
 0x104   :  { %v1224_v25 = vadd.f32 %v2529_v21, %v1153_v20  ;;  %v1256_v26 = vadd.f32 %v2529_v21, %v1185_v22 }
 0x105   :  { %v699_v27 = vpop.f32.mrf.mxu0  ;;  %v827_v28 = vpop.f32.mrf.mxu1 }
 0x106   :  { %v1154_v29 = vmul.f32 %v2523_v17, %v699_v27  ;;  %v1186_v30 = vmul.f32 %v2523_v17, %v827_v28  ;;  %v1288_v35 = vmax.f32 %v1224_v25, 0.0  ;;  %v1320_v36 = vmax.f32 %v1256_v26, 0.0 }
 0x107   :  { %v701_v31 = vpop.f32.mrf.mxu0  ;;  %v829_v32 = vpop.f32.mrf.mxu1 }
 0x108   :  { %v1225_v33 = vadd.f32 %v2529_v21, %v1154_v29  ;;  %v1257_v34 = vadd.f32 %v2529_v21, %v1186_v30 }
 0x109   :  { %v704_v37 = vpop.f32.mrf.mxu0  ;;  %v832_v38 = vpop.f32.mrf.mxu1 }
 0x10a   :  { %v1289_v39 = vmax.f32 %v1225_v33, 0.0  ;;  %v1321_v40 = vmax.f32 %v1257_v34, 0.0  ;;  %v1155_v41 = vmul.f32 %v2523_v17, %v704_v37  ;;  %v1187_v42 = vmul.f32 %v2523_v17, %v832_v38 }
 0x10b   :  { %v706_v43 = vpop.f32.mrf.mxu0  ;;  %v834_v44 = vpop.f32.mrf.mxu1 }
 0x10c   :  { %v1889_v45 = vpack.c.bf16 %v1289_v39, %v1288_v35  ;;  %v1969_v46 = vpack.c.bf16 %v1321_v40, %v1320_v36  ;;  %v1226_v47 = vadd.f32 %v2529_v21, %v1155_v41  ;;  %v1258_v48 = vadd.f32 %v2529_v21, %v1187_v42 }
 0x10d   :  { %v707_v49 = vpop.f32.mrf.mxu0  ;;  %v835_v50 = vpop.f32.mrf.mxu1 }
 0x10e   :  { %1890 = vst [vmem:[%s2758_s4] sm:$0xff] %v1889_v45   ;;  %2061 = vst [vmem:[%s2758_s4 + $0x80] sm:$0xff] %v1969_v46   ;;  %v1156_v51 = vmul.f32 %v2523_v17, %v707_v49  ;;  %v1188_v52 = vmul.f32 %v2523_v17, %v835_v50  ;;  %v1290_v57 = vmax.f32 %v1226_v47, 0.0  ;;  %v1322_v58 = vmax.f32 %v1258_v48, 0.0 }
 0x10f   :  { %v709_v53 = vpop.f32.mrf.mxu0  ;;  %v837_v54 = vpop.f32.mrf.mxu1 }
 0x110   :  { %v1227_v55 = vadd.f32 %v2529_v21, %v1156_v51  ;;  %v1259_v56 = vadd.f32 %v2529_v21, %v1188_v52 }
 0x111   :  { %v712_v59 = vpop.f32.mrf.mxu0  ;;  %v840_v60 = vpop.f32.mrf.mxu1 }
 0x112   :  { %v1291_v61 = vmax.f32 %v1227_v55, 0.0  ;;  %v1323_v62 = vmax.f32 %v1259_v56, 0.0  ;;  %v1157_v63 = vmul.f32 %v2523_v17, %v712_v59  ;;  %v1189_v0 = vmul.f32 %v2523_v17, %v840_v60 }
 0x113   :  { %v714_v1 = vpop.f32.mrf.mxu0  ;;  %v842_v2 = vpop.f32.mrf.mxu1 }
 0x114   :  { %v1894_v3 = vpack.c.bf16 %v1291_v61, %v1290_v57  ;;  %v1974_v4 = vpack.c.bf16 %v1323_v62, %v1322_v58  ;;  %v1228_v5 = vadd.f32 %v2529_v21, %v1157_v63  ;;  %v1260_v6 = vadd.f32 %v2529_v21, %v1189_v0 }
 0x115   :  { %v715_v7 = vpop.f32.mrf.mxu0  ;;  %v843_v8 = vpop.f32.mrf.mxu1 }
 0x116   :  { %2046 = vst [vmem:[%s2758_s4 + $0x8] sm:$0xff] %v1894_v3   ;;  %2062 = vst [vmem:[%s2758_s4 + $0x88] sm:$0xff] %v1974_v4   ;;  %v1158_v9 = vmul.f32 %v2523_v17, %v715_v7  ;;  %v1190_v10 = vmul.f32 %v2523_v17, %v843_v8  ;;  %v1292_v15 = vmax.f32 %v1228_v5, 0.0  ;;  %v1324_v16 = vmax.f32 %v1260_v6, 0.0 }
 0x117   :  { %v717_v11 = vpop.f32.mrf.mxu0  ;;  %v845_v12 = vpop.f32.mrf.mxu1 }
 0x118   :  { %v1229_v13 = vadd.f32 %v2529_v21, %v1158_v9  ;;  %v1261_v14 = vadd.f32 %v2529_v21, %v1190_v10 }
 0x119   :  { %v720_v18 = vpop.f32.mrf.mxu0  ;;  %v848_v19 = vpop.f32.mrf.mxu1 }
 0x11a   :  { %v1293_v20 = vmax.f32 %v1229_v13, 0.0  ;;  %v1325_v22 = vmax.f32 %v1261_v14, 0.0  ;;  %v1159_v23 = vmul.f32 %v2523_v17, %v720_v18  ;;  %v1191_v24 = vmul.f32 %v2523_v17, %v848_v19 }
 0x11b   :  { %v722_v25 = vpop.f32.mrf.mxu0  ;;  %v850_v26 = vpop.f32.mrf.mxu1 }
 0x11c   :  { %v1899_v27 = vpack.c.bf16 %v1293_v20, %v1292_v15  ;;  %v1979_v28 = vpack.c.bf16 %v1325_v22, %v1324_v16  ;;  %v1230_v29 = vadd.f32 %v2529_v21, %v1159_v23  ;;  %v1262_v30 = vadd.f32 %v2529_v21, %v1191_v24 }
 0x11d   :  { %v723_v31 = vpop.f32.mrf.mxu0  ;;  %v851_v32 = vpop.f32.mrf.mxu1 }
 0x11e   :  { %2047 = vst [vmem:[%s2758_s4 + $0x10] sm:$0xff] %v1899_v27   ;;  %2063 = vst [vmem:[%s2758_s4 + $0x90] sm:$0xff] %v1979_v28   ;;  %v1160_v33 = vmul.f32 %v2523_v17, %v723_v31  ;;  %v1192_v34 = vmul.f32 %v2523_v17, %v851_v32  ;;  %v1294_v39 = vmax.f32 %v1230_v29, 0.0  ;;  %v1326_v40 = vmax.f32 %v1262_v30, 0.0 }
 0x11f   :  { %v725_v35 = vpop.f32.mrf.mxu0  ;;  %v853_v36 = vpop.f32.mrf.mxu1 }
 0x120   :  { %v1231_v37 = vadd.f32 %v2529_v21, %v1160_v33  ;;  %v1263_v38 = vadd.f32 %v2529_v21, %v1192_v34 }
 0x121   :  { %v728_v41 = vpop.f32.mrf.mxu0  ;;  %v856_v42 = vpop.f32.mrf.mxu1 }
 0x122   :  { %v1295_v43 = vmax.f32 %v1231_v37, 0.0  ;;  %v1327_v44 = vmax.f32 %v1263_v38, 0.0  ;;  %v1161_v45 = vmul.f32 %v2523_v17, %v728_v41  ;;  %v1193_v46 = vmul.f32 %v2523_v17, %v856_v42 }
 0x123   :  { %v730_v47 = vpop.f32.mrf.mxu0  ;;  %v858_v48 = vpop.f32.mrf.mxu1 }
 0x124   :  { %v1904_v49 = vpack.c.bf16 %v1295_v43, %v1294_v39  ;;  %v1984_v50 = vpack.c.bf16 %v1327_v44, %v1326_v40  ;;  %v1232_v51 = vadd.f32 %v2529_v21, %v1161_v45  ;;  %v1264_v52 = vadd.f32 %v2529_v21, %v1193_v46 }
 0x125   :  { %v731_v53 = vpop.f32.mrf.mxu0  ;;  %v859_v54 = vpop.f32.mrf.mxu1 }
 0x126   :  { %2048 = vst [vmem:[%s2758_s4 + $0x18] sm:$0xff] %v1904_v49   ;;  %2064 = vst [vmem:[%s2758_s4 + $0x98] sm:$0xff] %v1984_v50   ;;  %v1162_v55 = vmul.f32 %v2523_v17, %v731_v53  ;;  %v1194_v56 = vmul.f32 %v2523_v17, %v859_v54  ;;  %v1296_v61 = vmax.f32 %v1232_v51, 0.0  ;;  %v1328_v62 = vmax.f32 %v1264_v52, 0.0 }
 0x127   :  { %v733_v57 = vpop.f32.mrf.mxu0  ;;  %v861_v58 = vpop.f32.mrf.mxu1 }
 0x128   :  { %v1233_v59 = vadd.f32 %v2529_v21, %v1162_v55  ;;  %v1265_v60 = vadd.f32 %v2529_v21, %v1194_v56 }
 0x129   :  { %v736_v63 = vpop.f32.mrf.mxu0  ;;  %v864_v0 = vpop.f32.mrf.mxu1 }
 0x12a   :  { %v1297_v1 = vmax.f32 %v1233_v59, 0.0  ;;  %v1329_v2 = vmax.f32 %v1265_v60, 0.0  ;;  %v1163_v3 = vmul.f32 %v2523_v17, %v736_v63  ;;  %v1195_v4 = vmul.f32 %v2523_v17, %v864_v0 }
 0x12b   :  { %v738_v5 = vpop.f32.mrf.mxu0  ;;  %v866_v6 = vpop.f32.mrf.mxu1 }
 0x12c   :  { %v1909_v7 = vpack.c.bf16 %v1297_v1, %v1296_v61  ;;  %v1989_v8 = vpack.c.bf16 %v1329_v2, %v1328_v62  ;;  %v1234_v9 = vadd.f32 %v2529_v21, %v1163_v3  ;;  %v1266_v10 = vadd.f32 %v2529_v21, %v1195_v4 }
 0x12d   :  { %v739_v11 = vpop.f32.mrf.mxu0  ;;  %v867_v12 = vpop.f32.mrf.mxu1 }
 0x12e   :  { %2049 = vst [vmem:[%s2758_s4 + $0x20] sm:$0xff] %v1909_v7   ;;  %2065 = vst [vmem:[%s2758_s4 + $0xa0] sm:$0xff] %v1989_v8   ;;  %v1164_v13 = vmul.f32 %v2523_v17, %v739_v11  ;;  %v1196_v14 = vmul.f32 %v2523_v17, %v867_v12  ;;  %v1298_v20 = vmax.f32 %v1234_v9, 0.0  ;;  %v1330_v22 = vmax.f32 %v1266_v10, 0.0 }
 0x12f   :  { %v741_v15 = vpop.f32.mrf.mxu0  ;;  %v869_v16 = vpop.f32.mrf.mxu1 }
 0x130   :  { %v1235_v18 = vadd.f32 %v2529_v21, %v1164_v13  ;;  %v1267_v19 = vadd.f32 %v2529_v21, %v1196_v14 }
 0x131   :  { %v744_v23 = vpop.f32.mrf.mxu0  ;;  %v872_v24 = vpop.f32.mrf.mxu1 }
 0x132   :  { %v1299_v25 = vmax.f32 %v1235_v18, 0.0  ;;  %v1331_v26 = vmax.f32 %v1267_v19, 0.0  ;;  %v1165_v27 = vmul.f32 %v2523_v17, %v744_v23  ;;  %v1197_v28 = vmul.f32 %v2523_v17, %v872_v24 }
 0x133   :  { %v746_v29 = vpop.f32.mrf.mxu0  ;;  %v874_v30 = vpop.f32.mrf.mxu1 }
 0x134   :  { %v1914_v31 = vpack.c.bf16 %v1299_v25, %v1298_v20  ;;  %v1994_v32 = vpack.c.bf16 %v1331_v26, %v1330_v22  ;;  %v1236_v33 = vadd.f32 %v2529_v21, %v1165_v27  ;;  %v1268_v34 = vadd.f32 %v2529_v21, %v1197_v28 }
 0x135   :  { %v747_v35 = vpop.f32.mrf.mxu0  ;;  %v875_v36 = vpop.f32.mrf.mxu1 }
 0x136   :  { %2050 = vst [vmem:[%s2758_s4 + $0x28] sm:$0xff] %v1914_v31   ;;  %2066 = vst [vmem:[%s2758_s4 + $0xa8] sm:$0xff] %v1994_v32   ;;  %v1166_v37 = vmul.f32 %v2523_v17, %v747_v35  ;;  %v1198_v38 = vmul.f32 %v2523_v17, %v875_v36  ;;  %v1300_v43 = vmax.f32 %v1236_v33, 0.0  ;;  %v1332_v44 = vmax.f32 %v1268_v34, 0.0 }
 0x137   :  { %v749_v39 = vpop.f32.mrf.mxu0  ;;  %v877_v40 = vpop.f32.mrf.mxu1 }
 0x138   :  { %v1237_v41 = vadd.f32 %v2529_v21, %v1166_v37  ;;  %v1269_v42 = vadd.f32 %v2529_v21, %v1198_v38 }
 0x139   :  { %v752_v45 = vpop.f32.mrf.mxu0  ;;  %v880_v46 = vpop.f32.mrf.mxu1 }
 0x13a   :  { %v1301_v47 = vmax.f32 %v1237_v41, 0.0  ;;  %v1333_v48 = vmax.f32 %v1269_v42, 0.0  ;;  %v1167_v49 = vmul.f32 %v2523_v17, %v752_v45  ;;  %v1199_v50 = vmul.f32 %v2523_v17, %v880_v46 }
 0x13b   :  { %v754_v51 = vpop.f32.mrf.mxu0  ;;  %v882_v52 = vpop.f32.mrf.mxu1 }
 0x13c   :  { %v1919_v53 = vpack.c.bf16 %v1301_v47, %v1300_v43  ;;  %v1999_v54 = vpack.c.bf16 %v1333_v48, %v1332_v44  ;;  %v1238_v55 = vadd.f32 %v2529_v21, %v1167_v49  ;;  %v1270_v56 = vadd.f32 %v2529_v21, %v1199_v50 }
 0x13d   :  { %v755_v57 = vpop.f32.mrf.mxu0  ;;  %v883_v58 = vpop.f32.mrf.mxu1 }
 0x13e   :  { %2051 = vst [vmem:[%s2758_s4 + $0x30] sm:$0xff] %v1919_v53   ;;  %2067 = vst [vmem:[%s2758_s4 + $0xb0] sm:$0xff] %v1999_v54   ;;  %v1168_v59 = vmul.f32 %v2523_v17, %v755_v57  ;;  %v1200_v60 = vmul.f32 %v2523_v17, %v883_v58  ;;  %v1302_v1 = vmax.f32 %v1238_v55, 0.0  ;;  %v1334_v2 = vmax.f32 %v1270_v56, 0.0 }
 0x13f   :  { %v757_v61 = vpop.f32.mrf.mxu0  ;;  %v885_v62 = vpop.f32.mrf.mxu1 }
 0x140   :  { %v1239_v63 = vadd.f32 %v2529_v21, %v1168_v59  ;;  %v1271_v0 = vadd.f32 %v2529_v21, %v1200_v60 }
 0x141   :  { %v760_v3 = vpop.f32.mrf.mxu0  ;;  %v888_v4 = vpop.f32.mrf.mxu1 }
 0x142   :  { %v1303_v5 = vmax.f32 %v1239_v63, 0.0  ;;  %v1335_v6 = vmax.f32 %v1271_v0, 0.0  ;;  %v1169_v7 = vmul.f32 %v2523_v17, %v760_v3  ;;  %v1201_v8 = vmul.f32 %v2523_v17, %v888_v4 }
 0x143   :  { %v762_v9 = vpop.f32.mrf.mxu0  ;;  %v890_v10 = vpop.f32.mrf.mxu1 }
 0x144   :  { %v1924_v11 = vpack.c.bf16 %v1303_v5, %v1302_v1  ;;  %v2004_v12 = vpack.c.bf16 %v1335_v6, %v1334_v2  ;;  %v1240_v13 = vadd.f32 %v2529_v21, %v1169_v7  ;;  %v1272_v14 = vadd.f32 %v2529_v21, %v1201_v8 }
 0x145   :  { %v763_v15 = vpop.f32.mrf.mxu0  ;;  %v891_v16 = vpop.f32.mrf.mxu1 }
 0x146   :  { %2052 = vst [vmem:[%s2758_s4 + $0x38] sm:$0xff] %v1924_v11   ;;  %2068 = vst [vmem:[%s2758_s4 + $0xb8] sm:$0xff] %v2004_v12   ;;  %v1170_v18 = vmul.f32 %v2523_v17, %v763_v15  ;;  %v1202_v19 = vmul.f32 %v2523_v17, %v891_v16  ;;  %v1304_v25 = vmax.f32 %v1240_v13, 0.0  ;;  %v1336_v26 = vmax.f32 %v1272_v14, 0.0 }
 0x147   :  { %v765_v20 = vpop.f32.mrf.mxu0  ;;  %v893_v22 = vpop.f32.mrf.mxu1 }
 0x148   :  { %v1241_v23 = vadd.f32 %v2529_v21, %v1170_v18  ;;  %v1273_v24 = vadd.f32 %v2529_v21, %v1202_v19 }
 0x149   :  { %v768_v27 = vpop.f32.mrf.mxu0  ;;  %v896_v28 = vpop.f32.mrf.mxu1 }
 0x14a   :  { %v1305_v29 = vmax.f32 %v1241_v23, 0.0  ;;  %v1337_v30 = vmax.f32 %v1273_v24, 0.0  ;;  %v1171_v31 = vmul.f32 %v2523_v17, %v768_v27  ;;  %v1203_v32 = vmul.f32 %v2523_v17, %v896_v28 }
 0x14b   :  { %v770_v33 = vpop.f32.mrf.mxu0  ;;  %v898_v34 = vpop.f32.mrf.mxu1 }
 0x14c   :  { %v1929_v35 = vpack.c.bf16 %v1305_v29, %v1304_v25  ;;  %v2009_v36 = vpack.c.bf16 %v1337_v30, %v1336_v26  ;;  %v1242_v37 = vadd.f32 %v2529_v21, %v1171_v31  ;;  %v1274_v38 = vadd.f32 %v2529_v21, %v1203_v32 }
 0x14d   :  { %v771_v39 = vpop.f32.mrf.mxu0  ;;  %v899_v40 = vpop.f32.mrf.mxu1 }
 0x14e   :  { %2053 = vst [vmem:[%s2758_s4 + $0x40] sm:$0xff] %v1929_v35   ;;  %2069 = vst [vmem:[%s2758_s4 + $0xc0] sm:$0xff] %v2009_v36   ;;  %v1172_v41 = vmul.f32 %v2523_v17, %v771_v39  ;;  %v1204_v42 = vmul.f32 %v2523_v17, %v899_v40  ;;  %v1306_v47 = vmax.f32 %v1242_v37, 0.0  ;;  %v1338_v48 = vmax.f32 %v1274_v38, 0.0 }
 0x14f   :  { %v773_v43 = vpop.f32.mrf.mxu0  ;;  %v901_v44 = vpop.f32.mrf.mxu1 }
 0x150   :  { %v1243_v45 = vadd.f32 %v2529_v21, %v1172_v41  ;;  %v1275_v46 = vadd.f32 %v2529_v21, %v1204_v42 }
 0x151   :  { %v776_v49 = vpop.f32.mrf.mxu0  ;;  %v904_v50 = vpop.f32.mrf.mxu1 }
 0x152   :  { %v1307_v51 = vmax.f32 %v1243_v45, 0.0  ;;  %v1339_v52 = vmax.f32 %v1275_v46, 0.0  ;;  %v1173_v53 = vmul.f32 %v2523_v17, %v776_v49  ;;  %v1205_v54 = vmul.f32 %v2523_v17, %v904_v50 }
 0x153   :  { %v778_v55 = vpop.f32.mrf.mxu0  ;;  %v906_v56 = vpop.f32.mrf.mxu1 }
 0x154   :  { %v1934_v57 = vpack.c.bf16 %v1307_v51, %v1306_v47  ;;  %v2014_v58 = vpack.c.bf16 %v1339_v52, %v1338_v48  ;;  %v1244_v59 = vadd.f32 %v2529_v21, %v1173_v53  ;;  %v1276_v60 = vadd.f32 %v2529_v21, %v1205_v54 }
 0x155   :  { %v779_v61 = vpop.f32.mrf.mxu0  ;;  %v907_v62 = vpop.f32.mrf.mxu1 }
 0x156   :  { %2054 = vst [vmem:[%s2758_s4 + $0x48] sm:$0xff] %v1934_v57   ;;  %2070 = vst [vmem:[%s2758_s4 + $0xc8] sm:$0xff] %v2014_v58   ;;  %v1174_v63 = vmul.f32 %v2523_v17, %v779_v61  ;;  %v1206_v0 = vmul.f32 %v2523_v17, %v907_v62  ;;  %v1308_v5 = vmax.f32 %v1244_v59, 0.0  ;;  %v1340_v6 = vmax.f32 %v1276_v60, 0.0 }
 0x157   :  { %v781_v1 = vpop.f32.mrf.mxu0  ;;  %v909_v2 = vpop.f32.mrf.mxu1 }
 0x158   :  { %v1245_v3 = vadd.f32 %v2529_v21, %v1174_v63  ;;  %v1277_v4 = vadd.f32 %v2529_v21, %v1206_v0 }
 0x159   :  { %v784_v7 = vpop.f32.mrf.mxu0  ;;  %v912_v8 = vpop.f32.mrf.mxu1 }
 0x15a   :  { %v1309_v9 = vmax.f32 %v1245_v3, 0.0  ;;  %v1341_v10 = vmax.f32 %v1277_v4, 0.0  ;;  %v1175_v11 = vmul.f32 %v2523_v17, %v784_v7  ;;  %v1207_v12 = vmul.f32 %v2523_v17, %v912_v8 }
 0x15b   :  { %v786_v13 = vpop.f32.mrf.mxu0  ;;  %v914_v14 = vpop.f32.mrf.mxu1 }
 0x15c   :  { %v1939_v15 = vpack.c.bf16 %v1309_v9, %v1308_v5  ;;  %v2019_v16 = vpack.c.bf16 %v1341_v10, %v1340_v6  ;;  %v1246_v18 = vadd.f32 %v2529_v21, %v1175_v11  ;;  %v1278_v19 = vadd.f32 %v2529_v21, %v1207_v12 }
 0x15d   :  { %v787_v20 = vpop.f32.mrf.mxu0  ;;  %v915_v22 = vpop.f32.mrf.mxu1 }
 0x15e   :  { %2055 = vst [vmem:[%s2758_s4 + $0x50] sm:$0xff] %v1939_v15   ;;  %2071 = vst [vmem:[%s2758_s4 + $0xd0] sm:$0xff] %v2019_v16   ;;  %v1176_v23 = vmul.f32 %v2523_v17, %v787_v20  ;;  %v1208_v24 = vmul.f32 %v2523_v17, %v915_v22  ;;  %v1310_v29 = vmax.f32 %v1246_v18, 0.0  ;;  %v1342_v30 = vmax.f32 %v1278_v19, 0.0 }
 0x15f   :  { %v789_v25 = vpop.f32.mrf.mxu0  ;;  %v917_v26 = vpop.f32.mrf.mxu1 }
 0x160   :  { %v1247_v27 = vadd.f32 %v2529_v21, %v1176_v23  ;;  %v1279_v28 = vadd.f32 %v2529_v21, %v1208_v24 }
 0x161   :  { %v792_v31 = vpop.f32.mrf.mxu0  ;;  %v920_v32 = vpop.f32.mrf.mxu1 }
 0x162   :  { %v1311_v33 = vmax.f32 %v1247_v27, 0.0  ;;  %v1343_v34 = vmax.f32 %v1279_v28, 0.0  ;;  %v1177_v35 = vmul.f32 %v2523_v17, %v792_v31  ;;  %v1209_v36 = vmul.f32 %v2523_v17, %v920_v32 }
 0x163   :  { %v794_v37 = vpop.f32.mrf.mxu0  ;;  %v922_v38 = vpop.f32.mrf.mxu1 }
 0x164   :  { %v1944_v39 = vpack.c.bf16 %v1311_v33, %v1310_v29  ;;  %v2024_v40 = vpack.c.bf16 %v1343_v34, %v1342_v30  ;;  %v1248_v41 = vadd.f32 %v2529_v21, %v1177_v35  ;;  %v1280_v42 = vadd.f32 %v2529_v21, %v1209_v36 }
 0x165   :  { %v795_v43 = vpop.f32.mrf.mxu0  ;;  %v923_v44 = vpop.f32.mrf.mxu1 }
 0x166   :  { %2056 = vst [vmem:[%s2758_s4 + $0x58] sm:$0xff] %v1944_v39   ;;  %2072 = vst [vmem:[%s2758_s4 + $0xd8] sm:$0xff] %v2024_v40   ;;  %v1178_v45 = vmul.f32 %v2523_v17, %v795_v43  ;;  %v1210_v46 = vmul.f32 %v2523_v17, %v923_v44  ;;  %v1312_v51 = vmax.f32 %v1248_v41, 0.0  ;;  %v1344_v52 = vmax.f32 %v1280_v42, 0.0 }
 0x167   :  { %v797_v47 = vpop.f32.mrf.mxu0  ;;  %v925_v48 = vpop.f32.mrf.mxu1 }
 0x168   :  { %v1249_v49 = vadd.f32 %v2529_v21, %v1178_v45  ;;  %v1281_v50 = vadd.f32 %v2529_v21, %v1210_v46 }
 0x169   :  { %v800_v53 = vpop.f32.mrf.mxu0  ;;  %v928_v54 = vpop.f32.mrf.mxu1 }
 0x16a   :  { %v1313_v55 = vmax.f32 %v1249_v49, 0.0  ;;  %v1345_v56 = vmax.f32 %v1281_v50, 0.0  ;;  %v1179_v57 = vmul.f32 %v2523_v17, %v800_v53  ;;  %v1211_v58 = vmul.f32 %v2523_v17, %v928_v54 }
 0x16b   :  { %v802_v59 = vpop.f32.mrf.mxu0  ;;  %v930_v60 = vpop.f32.mrf.mxu1 }
 0x16c   :  { %v1949_v61 = vpack.c.bf16 %v1313_v55, %v1312_v51  ;;  %v2029_v62 = vpack.c.bf16 %v1345_v56, %v1344_v52  ;;  %v1250_v63 = vadd.f32 %v2529_v21, %v1179_v57  ;;  %v1282_v0 = vadd.f32 %v2529_v21, %v1211_v58 }
 0x16d   :  { %v803_v1 = vpop.f32.mrf.mxu0  ;;  %v931_v2 = vpop.f32.mrf.mxu1 }
 0x16e   :  { %2057 = vst [vmem:[%s2758_s4 + $0x60] sm:$0xff] %v1949_v61   ;;  %2073 = vst [vmem:[%s2758_s4 + $0xe0] sm:$0xff] %v2029_v62   ;;  %v1180_v3 = vmul.f32 %v2523_v17, %v803_v1  ;;  %v1212_v4 = vmul.f32 %v2523_v17, %v931_v2  ;;  %v1314_v9 = vmax.f32 %v1250_v63, 0.0  ;;  %v1346_v10 = vmax.f32 %v1282_v0, 0.0 }
 0x16f   :  { %v805_v5 = vpop.f32.mrf.mxu0  ;;  %v933_v6 = vpop.f32.mrf.mxu1 }
 0x170   :  { %v1251_v7 = vadd.f32 %v2529_v21, %v1180_v3  ;;  %v1283_v8 = vadd.f32 %v2529_v21, %v1212_v4 }
 0x171   :  { %v808_v11 = vpop.f32.mrf.mxu0  ;;  %v936_v12 = vpop.f32.mrf.mxu1 }
 0x172   :  { %v1315_v13 = vmax.f32 %v1251_v7, 0.0  ;;  %v1347_v14 = vmax.f32 %v1283_v8, 0.0  ;;  %v1181_v15 = vmul.f32 %v2523_v17, %v808_v11  ;;  %v1213_v16 = vmul.f32 %v2523_v17, %v936_v12 }
 0x173   :  { %v810_v18 = vpop.f32.mrf.mxu0  ;;  %v938_v19 = vpop.f32.mrf.mxu1 }
 0x174   :  { %v1954_v20 = vpack.c.bf16 %v1315_v13, %v1314_v9  ;;  %v2034_v22 = vpack.c.bf16 %v1347_v14, %v1346_v10  ;;  %v1252_v23 = vadd.f32 %v2529_v21, %v1181_v15  ;;  %v1284_v24 = vadd.f32 %v2529_v21, %v1213_v16 }
 0x175   :  { %v811_v25 = vpop.f32.mrf.mxu0  ;;  %v939_v26 = vpop.f32.mrf.mxu1 }
 0x176   :  { %2058 = vst [vmem:[%s2758_s4 + $0x68] sm:$0xff] %v1954_v20   ;;  %2074 = vst [vmem:[%s2758_s4 + $0xe8] sm:$0xff] %v2034_v22   ;;  %v1182_v27 = vmul.f32 %v2523_v17, %v811_v25  ;;  %v1214_v28 = vmul.f32 %v2523_v17, %v939_v26  ;;  %v1316_v33 = vmax.f32 %v1252_v23, 0.0  ;;  %v1348_v34 = vmax.f32 %v1284_v24, 0.0 }
 0x177   :  { %v813_v29 = vpop.f32.mrf.mxu0  ;;  %v941_v30 = vpop.f32.mrf.mxu1 }
 0x178   :  { %v1253_v31 = vadd.f32 %v2529_v21, %v1182_v27  ;;  %v1285_v32 = vadd.f32 %v2529_v21, %v1214_v28 }
 0x179   :  { %v816_v35 = vpop.f32.mrf.mxu0  ;;  %v944_v36 = vpop.f32.mrf.mxu1 }
 0x17a   :  { %v1317_v37 = vmax.f32 %v1253_v31, 0.0  ;;  %v1349_v38 = vmax.f32 %v1285_v32, 0.0  ;;  %v1183_v39 = vmul.f32 %v2523_v17, %v816_v35  ;;  %v1215_v40 = vmul.f32 %v2523_v17, %v944_v36 }
 0x17b   :  { %v818_v41 = vpop.f32.mrf.mxu0  ;;  %v946_v42 = vpop.f32.mrf.mxu1 }
 0x17c   :  { %v1959_v43 = vpack.c.bf16 %v1317_v37, %v1316_v33  ;;  %v2039_v44 = vpack.c.bf16 %v1349_v38, %v1348_v34  ;;  %v1254_v47 = vadd.f32 %v2529_v21, %v1183_v39  ;;  %v1286_v48 = vadd.f32 %v2529_v21, %v1215_v40 }
 0x17d   :  { %v819_v45 = vpop.f32.mrf.mxu0  ;;  %v947_v46 = vpop.f32.mrf.mxu1 }
 0x17e   :  { %2059 = vst [vmem:[%s2758_s4 + $0x70] sm:$0xff] %v1959_v43   ;;  %2075 = vst [vmem:[%s2758_s4 + $0xf0] sm:$0xff] %v2039_v44   ;;  %v1184_v49 = vmul.f32 %v2523_v17, %v819_v45  ;;  %v1216_v50 = vmul.f32 %v2523_v17, %v947_v46  ;;  %v1318_v55 = vmax.f32 %v1254_v47, 0.0  ;;  %v1350_v56 = vmax.f32 %v1286_v48, 0.0 }
 0x17f   :  { %v821_v51 = vpop.f32.mrf.mxu0  ;;  %v949_v52 = vpop.f32.mrf.mxu1 }
 0x180   :  { %v1255_v53 = vadd.f32 %v2529_v21, %v1184_v49  ;;  %v1287_v54 = vadd.f32 %v2529_v21, %v1216_v50 }
 0x182   :  { %v1319_v57 = vmax.f32 %v1255_v53, 0.0  ;;  %v1351_v58 = vmax.f32 %v1287_v54, 0.0 }
 0x184   :  { %v1964_v59 = vpack.c.bf16 %v1319_v57, %v1318_v55  ;;  %v2044_v60 = vpack.c.bf16 %v1351_v58, %v1350_v56 }
 0x186   :  { %2060 = vst [vmem:[%s2758_s4 + $0x78] sm:$0xff] %v1964_v59   ;;  %2076 = vst [vmem:[%s2758_s4 + $0xf8] sm:$0xff] %v2044_v60  }

</bundles_post_ra>
